<compile_context>
chip_gen: v5e
topology: v5e:2x2
jax: 0.10.0
libtpu: 0.0.40
codegen_flags: <defaults>
</compile_context>

<pallas_src>
import math
import functools

import jax
import jax.numpy as jnp
from jax.experimental import pallas as pl
from jax.experimental.pallas import tpu as pltpu


def _mha_kernel(q_ref, k_ref, v_ref,
                wqkv_ref, bqkv_ref, wo_ref, bo_ref,
                o_ref,
                *, heads: int, d_k: int):
    bb, S, D = q_ref.shape
    M = bb * S

    # Activations -> bf16 for the MXU; flatten (batch_tile, S) -> rows.
    q2 = q_ref[...].reshape(M, D).astype(jnp.bfloat16)
    k2 = k_ref[...].reshape(M, D).astype(jnp.bfloat16)
    v2 = v_ref[...].reshape(M, D).astype(jnp.bfloat16)

    # Q/K/V projections (bf16 x bf16 -> f32 accumulate).  wq/bq were
    # pre-scaled by 1/sqrt(d_k) host-side, so no per-score scaling below.
    Q = (jnp.dot(q2, wqkv_ref[0], preferred_element_type=jnp.float32)
         + bqkv_ref[0]).reshape(bb, S, D)
    K = (jnp.dot(k2, wqkv_ref[1], preferred_element_type=jnp.float32)
         + bqkv_ref[1]).reshape(bb, S, D)
    V = (jnp.dot(v2, wqkv_ref[2], preferred_element_type=jnp.float32)
         + bqkv_ref[2]).reshape(bb, S, D)

    wo = wo_ref[...]                      # (D, D) bf16, loaded once
    acc = jnp.zeros((M, D), jnp.float32)  # output-projection accumulator

    for h in range(heads):                # static unrolled loop over heads
        lo = h * d_k
        qh = Q[:, :, lo:lo + d_k].astype(jnp.bfloat16)   # (bb, S, d_k)
        kh = K[:, :, lo:lo + d_k].astype(jnp.bfloat16)
        vh = V[:, :, lo:lo + d_k].astype(jnp.bfloat16)

        # scores: contract d_k directly (no explicit transpose), f32 result.
        s = jnp.einsum("bqd,bkd->bqk", qh, kh,
                       preferred_element_type=jnp.float32)
        # numerically stable softmax in f32; reciprocal on the (idle) EUP.
        s = s - jnp.max(s, axis=-1, keepdims=True)
        p = jnp.exp(s)
        p = p * pl.reciprocal(jnp.sum(p, axis=-1, keepdims=True), approx=True)

        ho = jnp.einsum("bqk,bkd->bqd", p.astype(jnp.bfloat16), vh,
                        preferred_element_type=jnp.float32)  # (bb, S, d_k)

        # Output projection accumulated per head: replaces concat + one dot.
        acc = acc + jnp.dot(ho.reshape(M, d_k).astype(jnp.bfloat16),
                            wo[lo:lo + d_k, :],
                            preferred_element_type=jnp.float32)

    out = acc + bo_ref[...]
    o_ref[...] = out.reshape(bb, S, D).astype(o_ref.dtype)


def multi_head_attention(q, k, v, params, *, heads: int, batch_block=None):
    """q, k, v: (B, S, D) float32.  params: (in,out) weights + (1,D) biases."""
    B, S, D = q.shape
    d_k = D // heads
    bb = B if batch_block is None else batch_block
    assert B % bb == 0
    scale = 1.0 / math.sqrt(d_k)

    # Host-side parameter packing (done once per model in practice):
    #  - fold 1/sqrt(d_k) into the Q projection,
    #  - pack Q/K/V weights into one bf16 slab (single weight DMA),
    #  - cast matmul weights to bf16, keep biases f32.
    w_qkv = jnp.stack([params["wq"] * scale, params["wk"], params["wv"]]
                      ).astype(jnp.bfloat16)                 # (3, D, D)
    b_qkv = jnp.stack([params["bq"] * scale, params["bk"], params["bv"]]
                      ).astype(jnp.float32)                  # (3, 1, D)
    wo = params["wo"].astype(jnp.bfloat16)                   # (D, D)
    bo = params["bo"].astype(jnp.float32)                    # (1, D)

    kernel = functools.partial(_mha_kernel, heads=heads, d_k=d_k)
    act_spec = pl.BlockSpec((bb, S, D), lambda i: (i, 0, 0))

    return pl.pallas_call(
        kernel,
        out_shape=jax.ShapeDtypeStruct((B, S, D), q.dtype),
        grid_spec=pltpu.PrefetchScalarGridSpec(
            num_scalar_prefetch=0,
            grid=(B // bb,),
            in_specs=[act_spec, act_spec, act_spec,
                      pl.BlockSpec((3, D, D), lambda i: (0, 0, 0)),
                      pl.BlockSpec((3, 1, D), lambda i: (0, 0, 0)),
                      pl.BlockSpec((D, D), lambda i: (0, 0)),
                      pl.BlockSpec((1, D), lambda i: (0, 0))],
            out_specs=act_spec,
        ),
        compiler_params=pltpu.CompilerParams(
            dimension_semantics=("parallel",)),
    )(q, k, v, w_qkv, b_qkv, wo, bo)


def _reference(q, k, v, params, heads):
    """Plain-JAX f32 reference mirroring the PyTorch forward (dropout in eval)."""
    B, S, D = q.shape
    d_k = D // heads

    def lin(x, w, b):
        return x @ w + b

    Q = lin(q, params["wq"], params["bq"]).reshape(B, S, heads, d_k).transpose(0, 2, 1, 3)
    K = lin(k, params["wk"], params["bk"]).reshape(B, S, heads, d_k).transpose(0, 2, 1, 3)
    V = lin(v, params["wv"], params["bv"]).reshape(B, S, heads, d_k).transpose(0, 2, 1, 3)

    scores = jnp.einsum("bhqd,bhkd->bhqk", Q, K) / math.sqrt(d_k)
    probs = jax.nn.softmax(scores, axis=-1)
    out = jnp.einsum("bhqk,bhkd->bhqd", probs, V)
    concat = out.transpose(0, 2, 1, 3).reshape(B, S, D)
    return lin(concat, params["wo"], params["bo"])


def _init_params(key, d_model):
    """Deterministic init, shapes matching nn.Linear(d_model, d_model)."""
    ks = jax.random.split(key, 8)
    bound = 1.0 / math.sqrt(d_model)

    def w(k):  # stored as (in, out) == PyTorch weight.T
        return jax.random.uniform(k, (d_model, d_model), jnp.float32, -bound, bound)

    def b(k):
        return jax.random.uniform(k, (1, d_model), jnp.float32, -bound, bound)

    return {
        "wq": w(ks[0]), "bq": b(ks[1]),
        "wk": w(ks[2]), "bk": b(ks[3]),
        "wv": w(ks[4]), "bv": b(ks[5]),
        "wo": w(ks[6]), "bo": b(ks[7]),
    }


if __name__ == "__main__":
    B, S, D, H = 2, 8, 32, 4   # batch, seq, d_model, heads  (d_k = 8)

    key = jax.random.PRNGKey(0)
    kq, kk, kv, kp = jax.random.split(key, 4)
    q = jax.random.normal(kq, (B, S, D), jnp.float32)
    k = jax.random.normal(kk, (B, S, D), jnp.float32)
    v = jax.random.normal(kv, (B, S, D), jnp.float32)
    params = _init_params(kp, D)

    out = multi_head_attention(q, k, v, params, heads=H)
    out = jax.block_until_ready(out)

    ref = _reference(q, k, v, params, H)
    assert out.shape == (B, S, D)
    # Tolerance accounts for bf16 MXU operands + EUP approximate reciprocal.
    assert jnp.allclose(out, ref, atol=3e-2, rtol=3e-2), "mismatch vs JAX reference"

    print("KERNEL_OK")
</pallas_src>

<mosaic_0001>
module attributes {stable_mosaic.version = 11 : i64} {
  func.func @_mha_kernel(%arg0: i32, %arg1: memref<2x8x32xf32, #tpu.memory_space<vmem>>, %arg2: memref<2x8x32xf32, #tpu.memory_space<vmem>>, %arg3: memref<2x8x32xf32, #tpu.memory_space<vmem>>, %arg4: memref<3x32x32xbf16, #tpu.memory_space<vmem>>, %arg5: memref<3x1x32xf32, #tpu.memory_space<vmem>>, %arg6: memref<32x32xbf16, #tpu.memory_space<vmem>>, %arg7: memref<1x32xf32, #tpu.memory_space<vmem>>, %arg8: memref<2x8x32xf32, #tpu.memory_space<vmem>>) attributes {dimension_semantics = [#tpu.dimension_semantics<parallel>], iteration_bounds = array<i64: 1>, scalar_prefetch = 0 : i64, scratch_operands = 0 : i64, tpu.core_type = #tpu.core_type<tc>, window_params = [{transform_indices = @transform_0, window_bounds = array<i64: 2, 8, 32>}, {transform_indices = @transform_1, window_bounds = array<i64: 2, 8, 32>}, {transform_indices = @transform_2, window_bounds = array<i64: 2, 8, 32>}, {pipeline_mode = #tpu.pipeline_mode<synchronous>, transform_indices = @transform_3, window_bounds = array<i64: 3, 32, 32>}, {pipeline_mode = #tpu.pipeline_mode<synchronous>, transform_indices = @transform_4, window_bounds = array<i64: 3, 1, 32>}, {pipeline_mode = #tpu.pipeline_mode<synchronous>, transform_indices = @transform_5, window_bounds = array<i64: 32, 32>}, {pipeline_mode = #tpu.pipeline_mode<synchronous>, transform_indices = @transform_6, window_bounds = array<i64: 1, 32>}, {transform_indices = @transform_7, window_bounds = array<i64: 2, 8, 32>}]} {
    %c0 = arith.constant 0 : index
    %c0_0 = arith.constant 0 : index
    %c0_1 = arith.constant 0 : index
    %0 = vector.load %arg1[%c0, %c0_0, %c0_1] : memref<2x8x32xf32, #tpu.memory_space<vmem>>, vector<2x8x32xf32>
    %1 = vector.shape_cast %0 : vector<2x8x32xf32> to vector<16x32xf32>
    %2 = arith.truncf %1 : vector<16x32xf32> to vector<16x32xbf16>
    %c0_2 = arith.constant 0 : index
    %c0_3 = arith.constant 0 : index
    %c0_4 = arith.constant 0 : index
    %3 = vector.load %arg2[%c0_2, %c0_3, %c0_4] : memref<2x8x32xf32, #tpu.memory_space<vmem>>, vector<2x8x32xf32>
    %4 = vector.shape_cast %3 : vector<2x8x32xf32> to vector<16x32xf32>
    %5 = arith.truncf %4 : vector<16x32xf32> to vector<16x32xbf16>
    %c0_5 = arith.constant 0 : index
    %c0_6 = arith.constant 0 : index
    %c0_7 = arith.constant 0 : index
    %6 = vector.load %arg3[%c0_5, %c0_6, %c0_7] : memref<2x8x32xf32, #tpu.memory_space<vmem>>, vector<2x8x32xf32>
    %7 = vector.shape_cast %6 : vector<2x8x32xf32> to vector<16x32xf32>
    %8 = arith.truncf %7 : vector<16x32xf32> to vector<16x32xbf16>
    %c0_8 = arith.constant 0 : index
    %c0_9 = arith.constant 0 : index
    %c0_10 = arith.constant 0 : index
    %9 = vector.load %arg4[%c0_8, %c0_9, %c0_10] : memref<3x32x32xbf16, #tpu.memory_space<vmem>>, vector<1x32x32xbf16>
    %10 = vector.shape_cast %9 : vector<1x32x32xbf16> to vector<32x32xbf16>
    %cst = arith.constant dense<0.000000e+00> : vector<16x32xf32>
    %11 = tpu.matmul %2, %10, %cst {dimension_numbers = #tpu.dot_dimension_numbers<[1], [0], [0], [1], [0, 0, 1, 1], [], []>} : vector<16x32xbf16>, vector<32x32xbf16>, vector<16x32xf32> -> vector<16x32xf32>
    %c0_11 = arith.constant 0 : index
    %c0_12 = arith.constant 0 : index
    %c0_13 = arith.constant 0 : index
    %12 = vector.load %arg5[%c0_11, %c0_12, %c0_13] : memref<3x1x32xf32, #tpu.memory_space<vmem>>, vector<1x1x32xf32>
    %13 = vector.shape_cast %12 : vector<1x1x32xf32> to vector<1x32xf32>
    %14 = vector.broadcast %13 : vector<1x32xf32> to vector<16x32xf32>
    %15 = arith.addf %11, %14 : vector<16x32xf32>
    %16 = vector.shape_cast %15 : vector<16x32xf32> to vector<2x8x32xf32>
    %c1 = arith.constant 1 : index
    %c0_14 = arith.constant 0 : index
    %c0_15 = arith.constant 0 : index
    %17 = vector.load %arg4[%c1, %c0_14, %c0_15] : memref<3x32x32xbf16, #tpu.memory_space<vmem>>, vector<1x32x32xbf16>
    %18 = vector.shape_cast %17 : vector<1x32x32xbf16> to vector<32x32xbf16>
    %cst_16 = arith.constant dense<0.000000e+00> : vector<16x32xf32>
    %19 = tpu.matmul %5, %18, %cst_16 {dimension_numbers = #tpu.dot_dimension_numbers<[1], [0], [0], [1], [0, 0, 1, 1], [], []>} : vector<16x32xbf16>, vector<32x32xbf16>, vector<16x32xf32> -> vector<16x32xf32>
    %c1_17 = arith.constant 1 : index
    %c0_18 = arith.constant 0 : index
    %c0_19 = arith.constant 0 : index
    %20 = vector.load %arg5[%c1_17, %c0_18, %c0_19] : memref<3x1x32xf32, #tpu.memory_space<vmem>>, vector<1x1x32xf32>
    %21 = vector.shape_cast %20 : vector<1x1x32xf32> to vector<1x32xf32>
    %22 = vector.broadcast %21 : vector<1x32xf32> to vector<16x32xf32>
    %23 = arith.addf %19, %22 : vector<16x32xf32>
    %24 = vector.shape_cast %23 : vector<16x32xf32> to vector<2x8x32xf32>
    %c2 = arith.constant 2 : index
    %c0_20 = arith.constant 0 : index
    %c0_21 = arith.constant 0 : index
    %25 = vector.load %arg4[%c2, %c0_20, %c0_21] : memref<3x32x32xbf16, #tpu.memory_space<vmem>>, vector<1x32x32xbf16>
    %26 = vector.shape_cast %25 : vector<1x32x32xbf16> to vector<32x32xbf16>
    %cst_22 = arith.constant dense<0.000000e+00> : vector<16x32xf32>
    %27 = tpu.matmul %8, %26, %cst_22 {dimension_numbers = #tpu.dot_dimension_numbers<[1], [0], [0], [1], [0, 0, 1, 1], [], []>} : vector<16x32xbf16>, vector<32x32xbf16>, vector<16x32xf32> -> vector<16x32xf32>
    %c2_23 = arith.constant 2 : index
    %c0_24 = arith.constant 0 : index
    %c0_25 = arith.constant 0 : index
    %28 = vector.load %arg5[%c2_23, %c0_24, %c0_25] : memref<3x1x32xf32, #tpu.memory_space<vmem>>, vector<1x1x32xf32>
    %29 = vector.shape_cast %28 : vector<1x1x32xf32> to vector<1x32xf32>
    %30 = vector.broadcast %29 : vector<1x32xf32> to vector<16x32xf32>
    %31 = arith.addf %27, %30 : vector<16x32xf32>
    %32 = vector.shape_cast %31 : vector<16x32xf32> to vector<2x8x32xf32>
    %c0_26 = arith.constant 0 : index
    %c0_27 = arith.constant 0 : index
    %33 = vector.load %arg6[%c0_26, %c0_27] : memref<32x32xbf16, #tpu.memory_space<vmem>>, vector<32x32xbf16>
    %cst_28 = arith.constant 0.000000e+00 : f32
    %34 = vector.broadcast %cst_28 : f32 to vector<16x32xf32>
    %35 = vector.extract_strided_slice %16 {offsets = [0, 0, 0], sizes = [2, 8, 8], strides = [1, 1, 1]} : vector<2x8x32xf32> to vector<2x8x8xf32>
    %36 = arith.truncf %35 : vector<2x8x8xf32> to vector<2x8x8xbf16>
    %37 = vector.extract_strided_slice %24 {offsets = [0, 0, 0], sizes = [2, 8, 8], strides = [1, 1, 1]} : vector<2x8x32xf32> to vector<2x8x8xf32>
    %38 = arith.truncf %37 : vector<2x8x8xf32> to vector<2x8x8xbf16>
    %39 = vector.extract_strided_slice %32 {offsets = [0, 0, 0], sizes = [2, 8, 8], strides = [1, 1, 1]} : vector<2x8x32xf32> to vector<2x8x8xf32>
    %40 = arith.truncf %39 : vector<2x8x8xf32> to vector<2x8x8xbf16>
    "tpu.trace_start"() <{level = 10 : i32, message = "bqd,bkd->bqk"}> : () -> ()
    %cst_29 = arith.constant dense<0.000000e+00> : vector<2x8x8xf32>
    %41 = tpu.matmul %36, %38, %cst_29 {dimension_numbers = #tpu.dot_dimension_numbers<[2], [2], [1], [1], [0, 0, 0, 1, 1, 1], [0], [0]>} : vector<2x8x8xbf16>, vector<2x8x8xbf16>, vector<2x8x8xf32> -> vector<2x8x8xf32>
    "tpu.trace_stop"() : () -> ()
    %cst_30 = arith.constant dense<0xFF800000> : vector<2x8xf32>
    %42 = vector.multi_reduction <maximumf>, %41, %cst_30 [2] : vector<2x8x8xf32> to vector<2x8xf32>
    %43 = vector.shape_cast %42 : vector<2x8xf32> to vector<2x8x1xf32>
    %44 = vector.broadcast %43 : vector<2x8x1xf32> to vector<2x8x8xf32>
    %45 = arith.subf %41, %44 : vector<2x8x8xf32>
    %46 = math.exp %45 : vector<2x8x8xf32>
    %cst_31 = arith.constant dense<0.000000e+00> : vector<2x8xf32>
    %47 = vector.multi_reduction <add>, %46, %cst_31 [2] : vector<2x8x8xf32> to vector<2x8xf32>
    %48 = vector.shape_cast %47 : vector<2x8xf32> to vector<2x8x1xf32>
    %49 = tpu.reciprocal %48 {approx = true} : vector<2x8x1xf32> -> vector<2x8x1xf32>
    %50 = vector.broadcast %49 : vector<2x8x1xf32> to vector<2x8x8xf32>
    %51 = arith.mulf %46, %50 : vector<2x8x8xf32>
    %52 = arith.truncf %51 : vector<2x8x8xf32> to vector<2x8x8xbf16>
    "tpu.trace_start"() <{level = 10 : i32, message = "bqk,bkd->bqd"}> : () -> ()
    %cst_32 = arith.constant dense<0.000000e+00> : vector<2x8x8xf32>
    %53 = tpu.matmul %52, %40, %cst_32 {dimension_numbers = #tpu.dot_dimension_numbers<[2], [1], [1], [2], [0, 0, 0, 1, 1, 2], [0], [0]>} : vector<2x8x8xbf16>, vector<2x8x8xbf16>, vector<2x8x8xf32> -> vector<2x8x8xf32>
    "tpu.trace_stop"() : () -> ()
    %54 = vector.shape_cast %53 : vector<2x8x8xf32> to vector<16x8xf32>
    %55 = arith.truncf %54 : vector<16x8xf32> to vector<16x8xbf16>
    %56 = vector.extract_strided_slice %33 {offsets = [0, 0], sizes = [8, 32], strides = [1, 1]} : vector<32x32xbf16> to vector<8x32xbf16>
    %cst_33 = arith.constant dense<0.000000e+00> : vector<16x32xf32>
    %57 = tpu.matmul %55, %56, %cst_33 {dimension_numbers = #tpu.dot_dimension_numbers<[1], [0], [0], [1], [0, 0, 1, 1], [], []>} : vector<16x8xbf16>, vector<8x32xbf16>, vector<16x32xf32> -> vector<16x32xf32>
    %58 = arith.addf %34, %57 : vector<16x32xf32>
    %59 = vector.extract_strided_slice %16 {offsets = [0, 0, 8], sizes = [2, 8, 8], strides = [1, 1, 1]} : vector<2x8x32xf32> to vector<2x8x8xf32>
    %60 = arith.truncf %59 : vector<2x8x8xf32> to vector<2x8x8xbf16>
    %61 = vector.extract_strided_slice %24 {offsets = [0, 0, 8], sizes = [2, 8, 8], strides = [1, 1, 1]} : vector<2x8x32xf32> to vector<2x8x8xf32>
    %62 = arith.truncf %61 : vector<2x8x8xf32> to vector<2x8x8xbf16>
    %63 = vector.extract_strided_slice %32 {offsets = [0, 0, 8], sizes = [2, 8, 8], strides = [1, 1, 1]} : vector<2x8x32xf32> to vector<2x8x8xf32>
    %64 = arith.truncf %63 : vector<2x8x8xf32> to vector<2x8x8xbf16>
    "tpu.trace_start"() <{level = 10 : i32, message = "bqd,bkd->bqk"}> : () -> ()
    %cst_34 = arith.constant dense<0.000000e+00> : vector<2x8x8xf32>
    %65 = tpu.matmul %60, %62, %cst_34 {dimension_numbers = #tpu.dot_dimension_numbers<[2], [2], [1], [1], [0, 0, 0, 1, 1, 1], [0], [0]>} : vector<2x8x8xbf16>, vector<2x8x8xbf16>, vector<2x8x8xf32> -> vector<2x8x8xf32>
    "tpu.trace_stop"() : () -> ()
    %cst_35 = arith.constant dense<0xFF800000> : vector<2x8xf32>
    %66 = vector.multi_reduction <maximumf>, %65, %cst_35 [2] : vector<2x8x8xf32> to vector<2x8xf32>
    %67 = vector.shape_cast %66 : vector<2x8xf32> to vector<2x8x1xf32>
    %68 = vector.broadcast %67 : vector<2x8x1xf32> to vector<2x8x8xf32>
    %69 = arith.subf %65, %68 : vector<2x8x8xf32>
    %70 = math.exp %69 : vector<2x8x8xf32>
    %cst_36 = arith.constant dense<0.000000e+00> : vector<2x8xf32>
    %71 = vector.multi_reduction <add>, %70, %cst_36 [2] : vector<2x8x8xf32> to vector<2x8xf32>
    %72 = vector.shape_cast %71 : vector<2x8xf32> to vector<2x8x1xf32>
    %73 = tpu.reciprocal %72 {approx = true} : vector<2x8x1xf32> -> vector<2x8x1xf32>
    %74 = vector.broadcast %73 : vector<2x8x1xf32> to vector<2x8x8xf32>
    %75 = arith.mulf %70, %74 : vector<2x8x8xf32>
    %76 = arith.truncf %75 : vector<2x8x8xf32> to vector<2x8x8xbf16>
    "tpu.trace_start"() <{level = 10 : i32, message = "bqk,bkd->bqd"}> : () -> ()
    %cst_37 = arith.constant dense<0.000000e+00> : vector<2x8x8xf32>
    %77 = tpu.matmul %76, %64, %cst_37 {dimension_numbers = #tpu.dot_dimension_numbers<[2], [1], [1], [2], [0, 0, 0, 1, 1, 2], [0], [0]>} : vector<2x8x8xbf16>, vector<2x8x8xbf16>, vector<2x8x8xf32> -> vector<2x8x8xf32>
    "tpu.trace_stop"() : () -> ()
    %78 = vector.shape_cast %77 : vector<2x8x8xf32> to vector<16x8xf32>
    %79 = arith.truncf %78 : vector<16x8xf32> to vector<16x8xbf16>
    %80 = vector.extract_strided_slice %33 {offsets = [8, 0], sizes = [8, 32], strides = [1, 1]} : vector<32x32xbf16> to vector<8x32xbf16>
    %cst_38 = arith.constant dense<0.000000e+00> : vector<16x32xf32>
    %81 = tpu.matmul %79, %80, %cst_38 {dimension_numbers = #tpu.dot_dimension_numbers<[1], [0], [0], [1], [0, 0, 1, 1], [], []>} : vector<16x8xbf16>, vector<8x32xbf16>, vector<16x32xf32> -> vector<16x32xf32>
    %82 = arith.addf %58, %81 : vector<16x32xf32>
    %83 = vector.extract_strided_slice %16 {offsets = [0, 0, 16], sizes = [2, 8, 8], strides = [1, 1, 1]} : vector<2x8x32xf32> to vector<2x8x8xf32>
    %84 = arith.truncf %83 : vector<2x8x8xf32> to vector<2x8x8xbf16>
    %85 = vector.extract_strided_slice %24 {offsets = [0, 0, 16], sizes = [2, 8, 8], strides = [1, 1, 1]} : vector<2x8x32xf32> to vector<2x8x8xf32>
    %86 = arith.truncf %85 : vector<2x8x8xf32> to vector<2x8x8xbf16>
    %87 = vector.extract_strided_slice %32 {offsets = [0, 0, 16], sizes = [2, 8, 8], strides = [1, 1, 1]} : vector<2x8x32xf32> to vector<2x8x8xf32>
    %88 = arith.truncf %87 : vector<2x8x8xf32> to vector<2x8x8xbf16>
    "tpu.trace_start"() <{level = 10 : i32, message = "bqd,bkd->bqk"}> : () -> ()
    %cst_39 = arith.constant dense<0.000000e+00> : vector<2x8x8xf32>
    %89 = tpu.matmul %84, %86, %cst_39 {dimension_numbers = #tpu.dot_dimension_numbers<[2], [2], [1], [1], [0, 0, 0, 1, 1, 1], [0], [0]>} : vector<2x8x8xbf16>, vector<2x8x8xbf16>, vector<2x8x8xf32> -> vector<2x8x8xf32>
    "tpu.trace_stop"() : () -> ()
    %cst_40 = arith.constant dense<0xFF800000> : vector<2x8xf32>
    %90 = vector.multi_reduction <maximumf>, %89, %cst_40 [2] : vector<2x8x8xf32> to vector<2x8xf32>
    %91 = vector.shape_cast %90 : vector<2x8xf32> to vector<2x8x1xf32>
    %92 = vector.broadcast %91 : vector<2x8x1xf32> to vector<2x8x8xf32>
    %93 = arith.subf %89, %92 : vector<2x8x8xf32>
    %94 = math.exp %93 : vector<2x8x8xf32>
    %cst_41 = arith.constant dense<0.000000e+00> : vector<2x8xf32>
    %95 = vector.multi_reduction <add>, %94, %cst_41 [2] : vector<2x8x8xf32> to vector<2x8xf32>
    %96 = vector.shape_cast %95 : vector<2x8xf32> to vector<2x8x1xf32>
    %97 = tpu.reciprocal %96 {approx = true} : vector<2x8x1xf32> -> vector<2x8x1xf32>
    %98 = vector.broadcast %97 : vector<2x8x1xf32> to vector<2x8x8xf32>
    %99 = arith.mulf %94, %98 : vector<2x8x8xf32>
    %100 = arith.truncf %99 : vector<2x8x8xf32> to vector<2x8x8xbf16>
    "tpu.trace_start"() <{level = 10 : i32, message = "bqk,bkd->bqd"}> : () -> ()
    %cst_42 = arith.constant dense<0.000000e+00> : vector<2x8x8xf32>
    %101 = tpu.matmul %100, %88, %cst_42 {dimension_numbers = #tpu.dot_dimension_numbers<[2], [1], [1], [2], [0, 0, 0, 1, 1, 2], [0], [0]>} : vector<2x8x8xbf16>, vector<2x8x8xbf16>, vector<2x8x8xf32> -> vector<2x8x8xf32>
    "tpu.trace_stop"() : () -> ()
    %102 = vector.shape_cast %101 : vector<2x8x8xf32> to vector<16x8xf32>
    %103 = arith.truncf %102 : vector<16x8xf32> to vector<16x8xbf16>
    %104 = vector.extract_strided_slice %33 {offsets = [16, 0], sizes = [8, 32], strides = [1, 1]} : vector<32x32xbf16> to vector<8x32xbf16>
    %cst_43 = arith.constant dense<0.000000e+00> : vector<16x32xf32>
    %105 = tpu.matmul %103, %104, %cst_43 {dimension_numbers = #tpu.dot_dimension_numbers<[1], [0], [0], [1], [0, 0, 1, 1], [], []>} : vector<16x8xbf16>, vector<8x32xbf16>, vector<16x32xf32> -> vector<16x32xf32>
    %106 = arith.addf %82, %105 : vector<16x32xf32>
    %107 = vector.extract_strided_slice %16 {offsets = [0, 0, 24], sizes = [2, 8, 8], strides = [1, 1, 1]} : vector<2x8x32xf32> to vector<2x8x8xf32>
    %108 = arith.truncf %107 : vector<2x8x8xf32> to vector<2x8x8xbf16>
    %109 = vector.extract_strided_slice %24 {offsets = [0, 0, 24], sizes = [2, 8, 8], strides = [1, 1, 1]} : vector<2x8x32xf32> to vector<2x8x8xf32>
    %110 = arith.truncf %109 : vector<2x8x8xf32> to vector<2x8x8xbf16>
    %111 = vector.extract_strided_slice %32 {offsets = [0, 0, 24], sizes = [2, 8, 8], strides = [1, 1, 1]} : vector<2x8x32xf32> to vector<2x8x8xf32>
    %112 = arith.truncf %111 : vector<2x8x8xf32> to vector<2x8x8xbf16>
    "tpu.trace_start"() <{level = 10 : i32, message = "bqd,bkd->bqk"}> : () -> ()
    %cst_44 = arith.constant dense<0.000000e+00> : vector<2x8x8xf32>
    %113 = tpu.matmul %108, %110, %cst_44 {dimension_numbers = #tpu.dot_dimension_numbers<[2], [2], [1], [1], [0, 0, 0, 1, 1, 1], [0], [0]>} : vector<2x8x8xbf16>, vector<2x8x8xbf16>, vector<2x8x8xf32> -> vector<2x8x8xf32>
    "tpu.trace_stop"() : () -> ()
    %cst_45 = arith.constant dense<0xFF800000> : vector<2x8xf32>
    %114 = vector.multi_reduction <maximumf>, %113, %cst_45 [2] : vector<2x8x8xf32> to vector<2x8xf32>
    %115 = vector.shape_cast %114 : vector<2x8xf32> to vector<2x8x1xf32>
    %116 = vector.broadcast %115 : vector<2x8x1xf32> to vector<2x8x8xf32>
    %117 = arith.subf %113, %116 : vector<2x8x8xf32>
    %118 = math.exp %117 : vector<2x8x8xf32>
    %cst_46 = arith.constant dense<0.000000e+00> : vector<2x8xf32>
    %119 = vector.multi_reduction <add>, %118, %cst_46 [2] : vector<2x8x8xf32> to vector<2x8xf32>
    %120 = vector.shape_cast %119 : vector<2x8xf32> to vector<2x8x1xf32>
    %121 = tpu.reciprocal %120 {approx = true} : vector<2x8x1xf32> -> vector<2x8x1xf32>
    %122 = vector.broadcast %121 : vector<2x8x1xf32> to vector<2x8x8xf32>
    %123 = arith.mulf %118, %122 : vector<2x8x8xf32>
    %124 = arith.truncf %123 : vector<2x8x8xf32> to vector<2x8x8xbf16>
    "tpu.trace_start"() <{level = 10 : i32, message = "bqk,bkd->bqd"}> : () -> ()
    %cst_47 = arith.constant dense<0.000000e+00> : vector<2x8x8xf32>
    %125 = tpu.matmul %124, %112, %cst_47 {dimension_numbers = #tpu.dot_dimension_numbers<[2], [1], [1], [2], [0, 0, 0, 1, 1, 2], [0], [0]>} : vector<2x8x8xbf16>, vector<2x8x8xbf16>, vector<2x8x8xf32> -> vector<2x8x8xf32>
    "tpu.trace_stop"() : () -> ()
    %126 = vector.shape_cast %125 : vector<2x8x8xf32> to vector<16x8xf32>
    %127 = arith.truncf %126 : vector<16x8xf32> to vector<16x8xbf16>
    %128 = vector.extract_strided_slice %33 {offsets = [24, 0], sizes = [8, 32], strides = [1, 1]} : vector<32x32xbf16> to vector<8x32xbf16>
    %cst_48 = arith.constant dense<0.000000e+00> : vector<16x32xf32>
    %129 = tpu.matmul %127, %128, %cst_48 {dimension_numbers = #tpu.dot_dimension_numbers<[1], [0], [0], [1], [0, 0, 1, 1], [], []>} : vector<16x8xbf16>, vector<8x32xbf16>, vector<16x32xf32> -> vector<16x32xf32>
    %130 = arith.addf %106, %129 : vector<16x32xf32>
    %c0_49 = arith.constant 0 : index
    %c0_50 = arith.constant 0 : index
    %131 = vector.load %arg7[%c0_49, %c0_50] : memref<1x32xf32, #tpu.memory_space<vmem>>, vector<1x32xf32>
    %132 = vector.broadcast %131 : vector<1x32xf32> to vector<16x32xf32>
    %133 = arith.addf %130, %132 : vector<16x32xf32>
    %134 = vector.shape_cast %133 : vector<16x32xf32> to vector<2x8x32xf32>
    %c0_51 = arith.constant 0 : index
    %c0_52 = arith.constant 0 : index
    %c0_53 = arith.constant 0 : index
    %135 = vector.load %arg8[%c0_51, %c0_52, %c0_53] : memref<2x8x32xf32, #tpu.memory_space<vmem>>, vector<2x8x32xf32>
    tpu.vector_store %arg8[%c0_51, %c0_52, %c0_53], %134 {strides = array<i32>} : memref<2x8x32xf32, #tpu.memory_space<vmem>>, vector<2x8x32xf32>,
    return
  }
  func.func @transform_0(%arg0: i32) -> (i32, i32, i32) {
    %c0_i32 = arith.constant 0 : i32
    %c0_i32_0 = arith.constant 0 : i32
    %c0_i32_1 = arith.constant 0 : i32
    return %arg0, %c0_i32, %c0_i32_0 : i32, i32, i32
  }
  func.func @transform_1(%arg0: i32) -> (i32, i32, i32) {
    %c0_i32 = arith.constant 0 : i32
    %c0_i32_0 = arith.constant 0 : i32
    %c0_i32_1 = arith.constant 0 : i32
    return %arg0, %c0_i32, %c0_i32_0 : i32, i32, i32
  }
  func.func @transform_2(%arg0: i32) -> (i32, i32, i32) {
    %c0_i32 = arith.constant 0 : i32
    %c0_i32_0 = arith.constant 0 : i32
    %c0_i32_1 = arith.constant 0 : i32
    return %arg0, %c0_i32, %c0_i32_0 : i32, i32, i32
  }
  func.func @transform_3(%arg0: i32) -> (i32, i32, i32) {
    %c0_i32 = arith.constant 0 : i32
    %c0_i32_0 = arith.constant 0 : i32
    %c0_i32_1 = arith.constant 0 : i32
    %c0_i32_2 = arith.constant 0 : i32
    return %c0_i32, %c0_i32_0, %c0_i32_1 : i32, i32, i32
  }
  func.func @transform_4(%arg0: i32) -> (i32, i32, i32) {
    %c0_i32 = arith.constant 0 : i32
    %c0_i32_0 = arith.constant 0 : i32
    %c0_i32_1 = arith.constant 0 : i32
    %c0_i32_2 = arith.constant 0 : i32
    return %c0_i32, %c0_i32_0, %c0_i32_1 : i32, i32, i32
  }
  func.func @transform_5(%arg0: i32) -> (i32, i32) {
    %c0_i32 = arith.constant 0 : i32
    %c0_i32_0 = arith.constant 0 : i32
    %c0_i32_1 = arith.constant 0 : i32
    return %c0_i32, %c0_i32_0 : i32, i32
  }
  func.func @transform_6(%arg0: i32) -> (i32, i32) {
    %c0_i32 = arith.constant 0 : i32
    %c0_i32_0 = arith.constant 0 : i32
    %c0_i32_1 = arith.constant 0 : i32
    return %c0_i32, %c0_i32_0 : i32, i32
  }
  func.func @transform_7(%arg0: i32) -> (i32, i32, i32) {
    %c0_i32 = arith.constant 0 : i32
    %c0_i32_0 = arith.constant 0 : i32
    %c0_i32_1 = arith.constant 0 : i32
    return %arg0, %c0_i32, %c0_i32_0 : i32, i32, i32
  }
}

</mosaic_0001>

<bundles_post_ra>
// kernel: tpu_custom_call.1
= control target key start
LH: loop header
LB: loop body
LE: loop exit
PB: predicated region body
PF: predicated region fallthrough
CT: control target
= control target key end

     0   :  { %12 = vsyncpa [#allocation3], 0  ;;  %s1288_s0 = inlined_call_operand.hbm [shape: f32[2,8,32], index: 0, kind: input, shape index: {}]   ;;  %s1289_s1 = inlined_call_operand.hbm [shape: f32[2,8,32], index: 1, kind: input, shape index: {}]   ;;  %s1290_s2 = inlined_call_operand.hbm [shape: f32[2,8,32], index: 2, kind: input, shape index: {}]   ;;  %s1291_s3 = inlined_call_operand.hbm [shape: bf16[3,32,32], index: 3, kind: input, shape index: {}]   ;;  %s1292_s4 = inlined_call_operand.vmem [shape: f32[3,1,32], index: 4, kind: input, shape index: {}]   ;;  %s1293_s5 = inlined_call_operand.hbm [shape: bf16[32,32], index: 5, kind: input, shape index: {}]   ;;  %s1294_s6 = inlined_call_operand.vmem [shape: f32[1,32], index: 6, kind: input, shape index: {}]   ;;  %s1295_s7 = inlined_call_operand.hbm [shape: f32[2,8,32], index: 7, kind: output, shape index: {}]  }
   0x1   :  { %13 = vsyncpa [#allocation6], 0 }
   0x2   :  { %14 = vsyncpa [#allocation9], 0 }
   0x3   :  { %15 = vsyncpa [#allocation4], 0  ;;  %s33_s26 = sshll.u32 %s1289_s1, 4  ;;  %s1070_s27 = smov [#allocation5]   ;;  %s34_s26 = int_to_ptr.hbm [resolvable:$true] %s33_s26 }
   0x4   :  { %s35_s28 = sshll.u32 %s1070_s27, 4  ;;  %s59_s8 = sshll.u32 %s1291_s3, 4  ;;  %s36_s28 = int_to_ptr.vmem [resolvable:$true] %s35_s28  ;;  %s60_s8 = int_to_ptr.hbm [resolvable:$true] %s59_s8 }
   0x5   :  { %s1071_s9 = smov 128   ;;  %s1072_s10 = smov 8  }
   0x6   :  { %41 = dma.hbm_to_vmem [thread:$0]  %s34_s26, 256, %s36_s28, [#allocation6], %s1071_s9, %s1071_s9, %s1072_s10  }
   0x7   :  { %s1073_s11 = smov [#allocation8]   ;;  %s1074_s13 = smov 64  }
   0x8   :  { %s61_s12 = sshll.u32 %s1073_s11, 4  ;;  %s1075_s1 = smov 4   ;;  %s62_s12 = int_to_ptr.vmem [resolvable:$true] %s61_s12 }
   0x9   :  { %67 = dma.hbm_to_vmem [thread:$0]  %s60_s8, 768, %s62_s12, [#allocation9], %s1074_s13, %s1074_s13, %s1075_s1  }
   0xa   :  { %s20_s16 = sshll.u32 %s1288_s0, 4  ;;  %s1076_s17 = smov [#allocation2]   ;;  %s21_s16 = int_to_ptr.hbm [resolvable:$true] %s20_s16 }
   0xb   :  { %s22_s3 = sshll.u32 %s1076_s17, 4  ;;  %s46_s20 = sshll.u32 %s1290_s2, 4  ;;  %s23_s3 = int_to_ptr.vmem [resolvable:$true] %s22_s3  ;;  %s47_s20 = int_to_ptr.hbm [resolvable:$true] %s46_s20 }
   0xc   :  { %28 = dma.hbm_to_vmem [thread:$0]  %s21_s16, 256, %s23_s3, [#allocation3], %s1071_s9, %s1071_s9, %s1072_s10  }
   0xd   :  { %s1077_s21 = smov [#allocation7]   ;;  %s74_s25 = sshll.u32 %s1293_s5, 4  ;;  %s75_s25 = int_to_ptr.hbm [resolvable:$true] %s74_s25 }
   0xe   :  { %s48_s22 = sshll.u32 %s1077_s21, 4  ;;  %s1078_s0 = smov [#allocation10]   ;;  %s49_s22 = int_to_ptr.vmem [resolvable:$true] %s48_s22 }
   0xf   :  { %54 = dma.hbm_to_vmem [thread:$0]  %s47_s20, 256, %s49_s22, [#allocation6], %s1071_s9, %s1071_s9, %s1072_s10  }
  0x10   :  { %s76_s26 = sshll.u32 %s1078_s0, 4  ;;  %s77_s26 = int_to_ptr.vmem [resolvable:$true] %s76_s26 }
  0x11   :  { %82 = dma.hbm_to_vmem [thread:$0]  %s75_s25, 256, %s77_s26, [#allocation9], %s1074_s13, %s1074_s13, %s1075_s1  }
  0x12   :  { %1062 = dma.done.wait [#allocation3], 256  }
  0x13   :  { %1063 = vsyncadd [#allocation3], 4294967040 }
  0x14   :  { %1064 = dma.done.wait [#allocation6], 512  }
  0x15   :  { %1065 = vsyncadd [#allocation6], 4294966784 }
  0x16   :  { %1066 = dma.done.wait [#allocation9], 1024  }
  0x17   :  { %1067 = vsyncadd [#allocation9], 4294966272  ;;  %v864_v0 = vld [vmem:[#allocation8 + $0x8] sm:$0xff]  ;;  %v866_v1 = vld [vmem:[#allocation8 + $0x18] sm:$0xff]  ;;  %vm135_vm0 = vcmask 261120   ;;  %vm241_vm1 = vcmask 64512  }
  0x18   :  { %v863_v2 = vld [vmem:[#allocation8] sm:$0xff]  ;;  %v865_v3 = vld [vmem:[#allocation8 + $0x10] sm:$0xff]  ;;  %v107_v5 = vld [vmem:[#allocation2 + $0x8] sm:$0xff]  ;;  %145 = vmatpush.bf16.msra.mxu0 %v864_v0  ;;  %184 = vmatpush.bf16.msra.mxu1 %v866_v1  ;;  %s1079_s29 = smov 120   ;;  %vm307_vm2 = vcmask 1043456   ;;  %s1081_s11 = smov 104  }
  0x19   :  { %v106_v4 = vld [vmem:[#allocation2] sm:$0xff]  ;;  %v109_v6 = vld [vmem:[#allocation5] sm:$0xff]  ;;  %v110_v7 = vld [vmem:[#allocation5 + $0x8] sm:$0xff]  ;;  %s1082_s1 = smov [#allocation11]   ;;  %s799_s17 = sshll.u32 %s1295_s7, 4  ;;  %s800_s17 = int_to_ptr.hbm [resolvable:$true] %s799_s17 }
  0x1a   :  { %v108_v8 = vpack.c.bf16 %v107_v5, %v106_v4  ;;  %v111_v9 = vpack.c.bf16 %v110_v7, %v109_v6  ;;  %v882_v10 = vld [vmem:[%s1292_s4] ss:$0 sm:$0xff]  ;;  %v883_v11 = vld [vmem:[%s1292_s4 + $0x1] ss:$0 sm:$0xff]  ;;  %v868_v34 = vld [vmem:[#allocation8 + $0x28] sm:$0xff]  ;;  %s797_s14 = sshll.u32 %s1082_s1, 4  ;;  %s798_s14 = int_to_ptr.vmem [resolvable:$true] %s797_s14 }
  0x1b   :  { %223 = vmatpush.bf16.msra.mxu2 %v868_v34  ;;  %v867_v35 = vld [vmem:[#allocation8 + $0x20] sm:$0xff]  ;;  %v112_v36 = vld [vmem:[#allocation7] sm:$0xff]  ;;  %v113_v37 = vld [vmem:[#allocation7 + $0x8] sm:$0xff] }
  0x1c   :  { %146 = vmatpush.bf16.msra.mxu0 %v863_v2  ;;  %185 = vmatpush.bf16.msra.mxu1 %v865_v3  ;;  %v114_v38 = vpack.c.bf16 %v113_v37, %v112_v36  ;;  %v884_v56 = vld [vmem:[%s1292_s4 + $0x2] ss:$0 sm:$0xff]  ;;  %s1080_s4 = smov 112  }
  0x1f   :  { %822 = vmatmul.msk.bf16.vlgmr.msra.gmra.mxu0 %vm135_vm0, %v108_v8  ;;  %832 = vmatmul.msk.bf16.vlgmr.msra.gmra.mxu1 %vm135_vm0, %v111_v9 }
  0x20   :  { %224 = vmatpush.bf16.msra.mxu2 %v867_v35 }
  0x23   :  { %842 = vmatmul.msk.bf16.vlgmr.msra.gmra.mxu2 %vm135_vm0, %v114_v38 }
  0x9c   :  { %v148_v12 = vpop.f32.mrf.mxu0  ;;  %v187_v13 = vpop.f32.mrf.mxu1 }
  0x9d   :  { %v149_v14 = vadd.f32 %v882_v10, %v148_v12  ;;  %v188_v15 = vadd.f32 %v883_v11, %v187_v13 }
  0x9f   :  { %v237_v16 = vpack.c.bf16 %v188_v15, %v188_v15  ;;  %v235_v17 = vpack.c.bf16 %v149_v14, %v149_v14 }
  0xa1   :  { %v350_v18 = vunpack.c.l.b16 %v237_v16  ;;  %v246_v19 = vsel %vm241_vm1, %v237_v16, 0  ;;  %v345_v23 = vunpack.c.l.b16 %v235_v17 }
  0xa2   :  { %255 = vmatpush.bf16.xpose.msra.mxu3 %v246_v19 }
  0xa3   :  { %v1156_v20 = vpack.c.b16 %v350_v18, %v350_v18  ;;  %v1160_v27 = vpack.c.b16 %v345_v23, %v345_v23 }
  0xa4   :  { %v150_v21 = vpop.f32.mrf.mxu0  ;;  %v189_v22 = vpop.f32.mrf.mxu1 }
  0xa5   :  { %v190_v24 = vadd.f32 %v883_v11, %v189_v22  ;;  %352 = vrot.lane.b32.xlu0 %v1156_v20, %s1079_s29  ;;  %v151_v25 = vadd.f32 %v882_v10, %v150_v21 }
  0xa6   :  { %v226_v57 = vpop.f32.mrf.mxu2 }
  0xa7   :  { %v238_v26 = vpack.c.bf16 %v190_v24, %v190_v24  ;;  %v236_v30 = vpack.c.bf16 %v151_v25, %v151_v25  ;;  %v227_v62 = vadd.f32 %v884_v56, %v226_v57 }
  0xa9   :  { %v379_v28 = vunpack.c.l.b16 %v238_v26  ;;  %843 = vmatmul.msk.bf16.vlgmr.msra.gmra.mxu3 %vm241_vm1, %v235_v17  ;;  %v265_v29 = vsel %vm241_vm1, %v238_v26, 0  ;;  %v374_v32 = vunpack.c.l.b16 %v236_v30  ;;  %v239_v63 = vpack.c.bf16 %v227_v62, %v227_v62  ;;  %v231_v62 = vld [vmem:[#allocation10] sm:$0xf] }
  0xaa   :  { %274 = vmatpush.bf16.xpose.msrb.mxu0 %v265_v29 }
  0xab   :  { %v1164_v31 = vpack.c.b16 %v379_v28, %v379_v28  ;;  %v1171_v33 = vpack.c.b16 %v374_v32, %v374_v32  ;;  %v427_v0 = vunpack.c.l.b16 %v239_v63  ;;  %v309_v8 = vsel %vm307_vm2, %v239_v63, 0 }
  0xac   :  { %318 = vmatpush.bf16.msrb.mxu1 %v309_v8  ;;  %v499_v63 = vsel %vm307_vm2, %v231_v62, 0 }
  0xad   :  { %381 = vrot.lane.b32.xlu1 %v1164_v31, %s1079_s29  ;;  %347 = vrot.lane.b32.xlu0 %v1160_v27, %s1079_s29  ;;  %v1190_v2 = vpack.c.b16 %v427_v0, %v427_v0 }
  0xae   :  { %v228_v1 = vpop.f32.mrf.mxu2 }
  0xaf   :  { %v229_v3 = vadd.f32 %v884_v56, %v228_v1 }
  0xb1   :  { %844 = vmatmul.msk.bf16.vlgmr.msrb.gmra.mxu0 %vm241_vm1, %v236_v30  ;;  %v240_v4 = vpack.c.bf16 %v229_v3, %v229_v3 }
  0xb3   :  { %v451_v5 = vunpack.c.l.b16 %v240_v4  ;;  %v328_v12 = vsel %vm307_vm2, %v240_v4, 0  ;;  %v232_v4 = vld [vmem:[#allocation10 + $0x4] sm:$0xf] }
  0xb4   :  { %337 = vmatpush.bf16.msrb.mxu2 %v328_v12 }
  0xb5   :  { %376 = vrot.lane.b32.xlu1 %v1171_v33, %s1079_s29  ;;  %v1198_v6 = vpack.c.b16 %v451_v5, %v451_v5  ;;  %v479_v5 = vsel %vm307_vm2, %v232_v4, 0 }
 0x117   :  { %v353_v39 = vpop.permute.xlu0 %352 }
 0x118   :  { %v358_v40 = vsel %vm241_vm1, %v353_v39, 0 }
 0x119   :  { %367 = vmatpush.bf16.xpose.msrb.mxu3 %v358_v40 }
 0x11f   :  { %v382_v41 = vpop.permute.xlu1 %381  ;;  %v348_v42 = vpop.permute.xlu0 %347 }
 0x120   :  { %v387_v43 = vsel %vm241_vm1, %v382_v41, 0  ;;  %847 = vmatmul.msk.bf16.vlgmr.msrb.gmra.mxu3 %vm241_vm1, %v348_v42 }
 0x121   :  { %396 = vmatpush.bf16.xpose.msra.mxu0 %v387_v43  ;;  %488 = vmatpush.bf16.msra.mxu3 %v479_v5 }
 0x127   :  { %v377_v44 = vpop.permute.xlu1 %376 }
 0x128   :  { %848 = vmatmul.msk.bf16.vlgmr.msra.gmra.mxu0 %vm241_vm1, %v377_v44 }
 0x129   :  { %508 = vmatpush.bf16.msrb.mxu0 %v499_v63 }
 0x12c   :  { %v257_v45 = vpop.f32.mrf.mxu3 }
 0x12d   :  { %v280_v46 = vsel %vm241_vm1, %v257_v45, -inf }
 0x12e   :  { %v1181_v47 = vpop.f32.mrf.mxu0  ;;  %281 = vmax.xlane.f32.xlu2 %v280_v46 }
 0x12f   :  { %v283_v7 = vsel %vm241_vm1, %v1181_v47, -inf }
 0x134   :  { %v259_v48 = vpop.f32.mrf.mxu3 }
 0x136   :  { %v278_v49 = vpop.f32.mrf.mxu0 }
 0x1a1   :  { %v282_v50 = vpop.xlane.xlu2 %281 }
 0x1a2   :  { %v286_v51 = vsub.f32 %v257_v45, %v282_v50 }
 0x1a3   :  { %v369_v52 = vpop.f32.mrf.mxu3 }
 0x1a4   :  { %v288_v53 = vmul.f32 1.442695, %v286_v51  ;;  %v402_v54 = vsel %vm241_vm1, %v369_v52, -inf }
 0x1a5   :  { %v1184_v55 = vpop.f32.mrf.mxu0  ;;  %403 = vmax.xlane.f32.xlu2 %v402_v54 }
 0x1a6   :  { %886 = vpow2.f32 %v288_v53  ;;  %v405_v23 = vsel %vm241_vm1, %v1184_v55, -inf }
 0x1ab   :  { %v371_v58 = vpop.f32.mrf.mxu3 }
 0x1ac   :  { %v887_v59 = vpop.eup %886 }
 0x1ad   :  { %v400_v60 = vpop.f32.mrf.mxu0  ;;  %v292_v61 = vsel %vm241_vm1, %v887_v59, 0.0 }
 0x1ae   :  { %293 = vadd.xlane.f32.xlu0 %v292_v61 }
 0x1bd   :  { %429 = vrot.lane.b32.xlu2 %v1190_v2, %s1079_s29 }
 0x1c2   :  { %515 = vrot.lane.b32.xlu0 %v1160_v27, %s1080_s4 }
 0x1c5   :  { %517 = vrot.lane.b32.xlu2 %v1156_v20, %s1080_s4 }
 0x1ca   :  { %453 = vrot.lane.b32.xlu0 %v1198_v6, %s1079_s29 }
 0x1d2   :  { %538 = vrot.lane.b32.xlu0 %v1171_v33, %s1080_s4 }
 0x1ee   :  { %284 = vmax.xlane.f32.xlu2 %v283_v7 }
 0x218   :  { %v404_v9 = vpop.xlane.xlu2 %403 }
 0x219   :  { %v408_v10 = vsub.f32 %v369_v52, %v404_v9 }
 0x21b   :  { %v410_v11 = vmul.f32 1.442695, %v408_v10 }
 0x21d   :  { %888 = vpow2.f32 %v410_v11 }
 0x220   :  { %v430_v13 = vpop.permute.xlu2 %429 }
 0x221   :  { %v435_v14 = vsel %vm307_vm2, %v430_v13, 0  ;;  %v294_v15 = vpop.xlane.xlu0 %293 }
 0x222   :  { %890 = vrcp.f32 %v294_v15  ;;  %444 = vmatpush.bf16.msra.mxu1 %v435_v14 }
 0x223   :  { %v889_v16 = vpop.eup %888 }
 0x224   :  { %v414_v17 = vsel %vm241_vm1, %v889_v16, 0.0 }
 0x225   :  { %415 = vadd.xlane.f32.xlu1 %v414_v17 }
 0x228   :  { %v891_v18 = vpop.eup %890  ;;  %v518_v21 = vpop.permute.xlu2 %517 }
 0x229   :  { %v300_v19 = vmul.f32 %v891_v18, %v887_v59  ;;  %v523_v24 = vsel %vm241_vm1, %v518_v21, 0 }
 0x22b   :  { %v302_v22 = vpack.c.bf16 %v300_v19, %v300_v19 }
 0x22d   :  { %845 = vmatmul.msk.bf16.vlgmr.msrb.gmra.mxu1 %vm241_vm1, %v302_v22  ;;  %406 = vmax.xlane.f32.xlu1 %v405_v23 }
 0x22e   :  { %532 = vmatpush.bf16.xpose.msrb.mxu1 %v523_v24 }
 0x234   :  { %v516_v25 = vpop.permute.xlu0 %515 }
 0x23c   :  { %v454_v26 = vpop.permute.xlu0 %453 }
 0x23d   :  { %v459_v28 = vsel %vm307_vm2, %v454_v26, 0 }
 0x23e   :  { %468 = vmatpush.bf16.msra.mxu2 %v459_v28 }
 0x244   :  { %v539_v59 = vpop.permute.xlu0 %538 }
 0x261   :  { %v285_v29 = vpop.xlane.xlu2 %284 }
 0x262   :  { %v287_v30 = vsub.f32 %v1181_v47, %v285_v29 }
 0x264   :  { %v290_v32 = vmul.f32 1.442695, %v287_v30 }
 0x266   :  { %892 = vpow2.f32 %v290_v32 }
 0x26c   :  { %v893_v34 = vpop.eup %892 }
 0x26d   :  { %v295_v35 = vsel %vm241_vm1, %v893_v34, 0.0 }
 0x26e   :  { %296 = vadd.xlane.f32.xlu1 %v295_v35 }
 0x298   :  { %v416_v36 = vpop.xlane.xlu1 %415 }
 0x299   :  { %894 = vrcp.f32 %v416_v36 }
 0x29f   :  { %v895_v37 = vpop.eup %894 }
 0x2a0   :  { %v422_v38 = vmul.f32 %v895_v37, %v889_v16  ;;  %v407_v39 = vpop.xlane.xlu1 %406 }
 0x2a1   :  { %v409_v40 = vsub.f32 %v1184_v55, %v407_v39 }
 0x2a2   :  { %v424_v41 = vpack.c.bf16 %v422_v38, %v422_v38 }
 0x2a3   :  { %v412_v42 = vmul.f32 1.442695, %v409_v40 }
 0x2a4   :  { %849 = vmatmul.msk.bf16.vlgmr.msra.gmra.mxu1 %vm241_vm1, %v424_v41 }
 0x2a5   :  { %896 = vpow2.f32 %v412_v42 }
 0x2aa   :  { %v320_v43 = vpop.f32.mrf.mxu1 }
 0x2ab   :  { %v897_v44 = vpop.eup %896 }
 0x2ac   :  { %v417_v45 = vsel %vm241_vm1, %v897_v44, 0.0 }
 0x2ad   :  { %418 = vadd.xlane.f32.xlu1 %v417_v45 }
 0x2b2   :  { %v322_v46 = vpop.f32.mrf.mxu1 }
 0x2b4   :  { %853 = vmatmul.msk.bf16.vlgmr.msrb.gmra.mxu1 %vm241_vm1, %v516_v25 }
 0x2c6   :  { %540 = vrot.lane.b32.xlu1 %v1164_v31, %s1080_s4 }
 0x2ce   :  { %652 = vrot.lane.b32.xlu1 %v1156_v20, %s1081_s11 }
 0x2d6   :  { %675 = vrot.lane.b32.xlu1 %v1164_v31, %s1081_s11 }
 0x2de   :  { %673 = vrot.lane.b32.xlu1 %v1171_v33, %s1081_s11 }
 0x2e1   :  { %v297_v47 = vpop.xlane.xlu1 %296 }
 0x2e2   :  { %898 = vrcp.f32 %v297_v47 }
 0x2e8   :  { %v899_v48 = vpop.eup %898 }
 0x2e9   :  { %v301_v49 = vmul.f32 %v899_v48, %v893_v34 }
 0x2eb   :  { %v303_v50 = vpack.c.bf16 %v301_v49, %v301_v49 }
 0x2ed   :  { %846 = vmatmul.msk.bf16.vlgmr.msrb.gmra.mxu2 %vm241_vm1, %v303_v50 }
 0x320   :  { %v419_v51 = vpop.xlane.xlu1 %418 }
 0x321   :  { %900 = vrcp.f32 %v419_v51  ;;  %v446_v52 = vpop.f32.mrf.mxu1 }
 0x327   :  { %v901_v53 = vpop.eup %900 }
 0x328   :  { %v423_v54 = vmul.f32 %v901_v53, %v897_v44 }
 0x329   :  { %v448_v55 = vpop.f32.mrf.mxu1 }
 0x32a   :  { %v425_v20 = vpack.c.bf16 %v423_v54, %v423_v54 }
 0x32c   :  { %850 = vmatmul.msk.bf16.vlgmr.msra.gmra.mxu2 %vm241_vm1, %v425_v20 }
 0x331   :  { %v534_v31 = vpop.f32.mrf.mxu1 }
 0x332   :  { %v561_v56 = vsel %vm241_vm1, %v534_v31, -inf }
 0x333   :  { %562 = vmax.xlane.f32.xlu2 %v561_v56 }
 0x338   :  { %v541_v33 = vpop.permute.xlu1 %540 }
 0x339   :  { %v546_v57 = vsel %vm241_vm1, %v541_v33, 0  ;;  %v536_v58 = vpop.f32.mrf.mxu1  ;;  %v233_v33 = vld [vmem:[#allocation10 + $0x8] sm:$0xf] }
 0x33a   :  { %555 = vmatpush.bf16.xpose.msrb.mxu2 %v546_v57  ;;  %v632_v57 = vsel %vm307_vm2, %v233_v33, 0 }
 0x33b   :  { %641 = vmatpush.bf16.msra.mxu1 %v632_v57 }
 0x340   :  { %v653_v60 = vpop.permute.xlu1 %652 }
 0x341   :  { %v658_v61 = vsel %vm241_vm1, %v653_v60, 0  ;;  %854 = vmatmul.msk.bf16.vlgmr.msrb.gmra.mxu2 %vm241_vm1, %v539_v59 }
 0x342   :  { %667 = vmatpush.bf16.xpose.msra.mxu2 %v658_v61 }
 0x348   :  { %v676_v11 = vpop.permute.xlu1 %675 }
 0x349   :  { %v681_v15 = vsel %vm241_vm1, %v676_v11, 0 }
 0x34b   :  { %585 = vrot.lane.b32.xlu2 %v1190_v2, %s1080_s4 }
 0x350   :  { %v674_v40 = vpop.permute.xlu1 %673 }
 0x353   :  { %650 = vrot.lane.b32.xlu2 %v1160_v27, %s1081_s11 }
 0x370   :  { %v339_v0 = vpop.f32.mrf.mxu2 }
 0x371   :  { %v343_v1 = vpack.c.bf16 %v339_v0, %v320_v43 }
 0x373   :  { %852 = vmatmul.msk.bf16.vlgmr.msrb.gmra.mxu0 %vm241_vm1, %v343_v1 }
 0x378   :  { %v341_v3 = vpop.f32.mrf.mxu2 }
 0x3a6   :  { %v563_v7 = vpop.xlane.xlu2 %562 }
 0x3a7   :  { %v567_v8 = vsub.f32 %v534_v31, %v563_v7 }
 0x3a9   :  { %v569_v9 = vmul.f32 1.442695, %v567_v8 }
 0x3ab   :  { %902 = vpow2.f32 %v569_v9 }
 0x3ae   :  { %v586_v10 = vpop.permute.xlu2 %585 }
 0x3af   :  { %v591_v12 = vsel %vm307_vm2, %v586_v10, 0  ;;  %v470_v13 = vpop.f32.mrf.mxu2 }
 0x3b0   :  { %v474_v14 = vpack.c.bf16 %v470_v13, %v446_v52  ;;  %600 = vmatpush.bf16.msrb.mxu3 %v591_v12 }
 0x3b1   :  { %v903_v27 = vpop.eup %902 }
 0x3b2   :  { %851 = vmatmul.msk.bf16.vlgmr.msra.gmra.mxu3 %vm241_vm1, %v474_v14  ;;  %v573_v16 = vsel %vm241_vm1, %v903_v27, 0.0 }
 0x3b3   :  { %574 = vadd.xlane.f32.xlu0 %v573_v16 }
 0x3b4   :  { %690 = vmatpush.bf16.xpose.msra.mxu3 %v681_v15 }
 0x3b6   :  { %v651_v17 = vpop.permute.xlu2 %650 }
 0x3b7   :  { %v472_v18 = vpop.f32.mrf.mxu2  ;;  %858 = vmatmul.msk.bf16.vlgmr.msra.gmra.mxu2 %vm241_vm1, %v651_v17 }
 0x3c4   :  { %v557_v19 = vpop.f32.mrf.mxu2 }
 0x3c5   :  { %v564_v21 = vsel %vm241_vm1, %v557_v19, -inf }
 0x3c6   :  { %565 = vmax.xlane.f32.xlu2 %v564_v21 }
 0x3c7   :  { %606 = vrot.lane.b32.xlu0 %v1198_v6, %s1080_s4 }
 0x3cc   :  { %v559_v22 = vpop.f32.mrf.mxu2 }
 0x3f0   :  { %v510_v28 = vpop.f32.mrf.mxu0 }
 0x3f8   :  { %v512_v58 = vpop.f32.mrf.mxu0 }
 0x426   :  { %v575_v23 = vpop.xlane.xlu0 %574 }
 0x427   :  { %904 = vrcp.f32 %v575_v23 }
 0x42d   :  { %v905_v24 = vpop.eup %904 }
 0x42e   :  { %v581_v25 = vmul.f32 %v905_v24, %v903_v27 }
 0x430   :  { %v583_v26 = vpack.c.bf16 %v581_v25, %v581_v25  ;;  %v885_v25 = vld [vmem:[%s1294_s6] ss:$0 sm:$0xff] }
 0x432   :  { %855 = vmatmul.msk.bf16.vlgmr.msrb.gmra.mxu3 %vm241_vm1, %v583_v26 }
 0x435   :  { %v490_v29 = vpop.f32.mrf.mxu3 }
 0x436   :  { %v1251_v30 = vadd.f32 %v510_v28, %v490_v29 }
 0x439   :  { %v607_v32 = vpop.permute.xlu0 %606  ;;  %v566_v34 = vpop.xlane.xlu2 %565 }
 0x43a   :  { %v612_v35 = vsel %vm307_vm2, %v607_v32, 0  ;;  %v568_v36 = vsub.f32 %v557_v19, %v566_v34  ;;  %v669_v37 = vpop.f32.mrf.mxu2  ;;  %v234_v19 = vld [vmem:[#allocation10 + $0xc] sm:$0xf] }
 0x43b   :  { %621 = vmatpush.bf16.msra.mxu0 %v612_v35  ;;  %v696_v38 = vsel %vm241_vm1, %v669_v37, -inf  ;;  %v767_v21 = vsel %vm307_vm2, %v234_v19, 0 }
 0x43c   :  { %v571_v39 = vmul.f32 1.442695, %v568_v36  ;;  %697 = vmax.xlane.f32.xlu0 %v696_v38  ;;  %776 = vmatpush.bf16.msrb.mxu2 %v767_v21 }
 0x43d   :  { %v1257_v44 = vpop.f32.mrf.mxu3 }
 0x43e   :  { %906 = vpow2.f32 %v571_v39 }
 0x442   :  { %v671_v41 = vpop.f32.mrf.mxu2  ;;  %859 = vmatmul.msk.bf16.vlgmr.msra.gmra.mxu3 %vm241_vm1, %v674_v40 }
 0x444   :  { %v907_v42 = vpop.eup %906 }
 0x445   :  { %v576_v43 = vsel %vm241_vm1, %v907_v42, 0.0 }
 0x446   :  { %577 = vadd.xlane.f32.xlu1 %v576_v43 }
 0x4af   :  { %v698_v45 = vpop.xlane.xlu0 %697 }
 0x4b0   :  { %v702_v46 = vsub.f32 %v669_v37, %v698_v45 }
 0x4b2   :  { %v704_v47 = vmul.f32 1.442695, %v702_v46 }
 0x4b4   :  { %908 = vpow2.f32 %v704_v47 }
 0x4b5   :  { %v602_v48 = vpop.f32.mrf.mxu3 }
 0x4b9   :  { %v578_v49 = vpop.xlane.xlu1 %577 }
 0x4ba   :  { %v909_v50 = vpop.eup %908  ;;  %910 = vrcp.f32 %v578_v49 }
 0x4bb   :  { %v708_v51 = vsel %vm241_vm1, %v909_v50, 0.0 }
 0x4bc   :  { %709 = vadd.xlane.f32.xlu1 %v708_v51 }
 0x4bd   :  { %v604_v52 = vpop.f32.mrf.mxu3 }
 0x4c0   :  { %v911_v53 = vpop.eup %910 }
 0x4c1   :  { %v582_v54 = vmul.f32 %v911_v53, %v907_v42 }
 0x4c3   :  { %v584_v55 = vpack.c.bf16 %v582_v54, %v582_v54 }
 0x4c5   :  { %856 = vmatmul.msk.bf16.vlgmr.msra.gmra.mxu0 %vm241_vm1, %v584_v55  ;;  %v692_v20 = vpop.f32.mrf.mxu3 }
 0x4c6   :  { %v699_v31 = vsel %vm241_vm1, %v692_v20, -inf }
 0x4c7   :  { %700 = vmax.xlane.f32.xlu2 %v699_v31 }
 0x4cd   :  { %v694_v56 = vpop.f32.mrf.mxu3 }
 0x4d5   :  { %720 = vrot.lane.b32.xlu1 %v1190_v2, %s1081_s11 }
 0x52f   :  { %v710_v59 = vpop.xlane.xlu1 %709 }
 0x530   :  { %912 = vrcp.f32 %v710_v59 }
 0x536   :  { %v913_v0 = vpop.eup %912 }
 0x537   :  { %v716_v4 = vmul.f32 %v913_v0, %v909_v50 }
 0x539   :  { %v718_v8 = vpack.c.bf16 %v716_v4, %v716_v4 }
 0x53a   :  { %v701_v60 = vpop.xlane.xlu2 %700 }
 0x53b   :  { %v703_v61 = vsub.f32 %v692_v20, %v701_v60 }
 0x53d   :  { %v706_v62 = vmul.f32 1.442695, %v703_v61 }
 0x53f   :  { %914 = vpow2.f32 %v706_v62 }
 0x542   :  { %v623_v63 = vpop.f32.mrf.mxu0 }
 0x543   :  { %v627_v1 = vpack.c.bf16 %v623_v63, %v602_v48 }
 0x545   :  { %v915_v3 = vpop.eup %914  ;;  %857 = vmatmul.msk.bf16.vlgmr.msra.gmra.mxu1 %vm241_vm1, %v627_v1 }
 0x546   :  { %v711_v2 = vsel %vm241_vm1, %v915_v3, 0.0 }
 0x547   :  { %v721_v5 = vpop.permute.xlu1 %720  ;;  %712 = vadd.xlane.f32.xlu2 %v711_v2 }
 0x548   :  { %v726_v7 = vsel %vm307_vm2, %v721_v5, 0 }
 0x549   :  { %735 = vmatpush.bf16.msrb.mxu0 %v726_v7 }
 0x54a   :  { %v625_v9 = vpop.f32.mrf.mxu0 }
 0x54c   :  { %860 = vmatmul.msk.bf16.vlgmr.msrb.gmra.mxu0 %vm241_vm1, %v718_v8 }
 0x55f   :  { %741 = vrot.lane.b32.xlu2 %v1198_v6, %s1081_s11 }
 0x5ba   :  { %v713_v10 = vpop.xlane.xlu2 %712 }
 0x5bb   :  { %916 = vrcp.f32 %v713_v10 }
 0x5c1   :  { %v917_v11 = vpop.eup %916 }
 0x5c2   :  { %v717_v12 = vmul.f32 %v917_v11, %v915_v3  ;;  %v643_v13 = vpop.f32.mrf.mxu1  ;;  %v742_v14 = vpop.permute.xlu2 %741 }
 0x5c3   :  { %v648_v27 = vadd.f32 %v643_v13, %v1251_v30  ;;  %v747_v15 = vsel %vm307_vm2, %v742_v14, 0  ;;  %v513_v30 = vadd.f32 %v512_v58, %v1257_v44 }
 0x5c4   :  { %v719_v16 = vpack.c.bf16 %v717_v12, %v717_v12  ;;  %756 = vmatpush.bf16.msrb.mxu1 %v747_v15 }
 0x5c7   :  { %861 = vmatmul.msk.bf16.vlgmr.msrb.gmra.mxu1 %vm241_vm1, %v719_v16 }
 0x5c9   :  { %v737_v17 = vpop.f32.mrf.mxu0 }
 0x5ca   :  { %v645_v6 = vpop.f32.mrf.mxu1 }
 0x5cb   :  { %v649_v32 = vadd.f32 %v645_v6, %v513_v30 }
 0x5d1   :  { %v739_v18 = vpop.f32.mrf.mxu0 }
 0x644   :  { %v758_v22 = vpop.f32.mrf.mxu1 }
 0x645   :  { %v762_v23 = vpack.c.bf16 %v758_v22, %v737_v17 }
 0x647   :  { %862 = vmatmul.msk.bf16.vlgmr.msrb.gmra.mxu2 %vm241_vm1, %v762_v23 }
 0x64c   :  { %v760_v24 = vpop.f32.mrf.mxu1 }
 0x6ca   :  { %v778_v26 = vpop.f32.mrf.mxu2 }
 0x6cb   :  { %v783_v28 = vadd.f32 %v778_v26, %v648_v27 }
 0x6cd   :  { %v789_v29 = vadd.f32 %v885_v25, %v783_v28 }
 0x6cf   :  { %791 = vst.msk [vmem:[#allocation11] sm:$0xff] %vm135_vm0, %v789_v29 }
 0x6d2   :  { %v780_v34 = vpop.f32.mrf.mxu2 }
 0x6d3   :  { %v784_v35 = vadd.f32 %v780_v34, %v649_v32 }
 0x6d5   :  { %v790_v36 = vadd.f32 %v885_v25, %v784_v35 }
 0x6d7   :  { %792 = vst.msk [vmem:[#allocation11 + $0x8] sm:$0xff] %vm135_vm0, %v790_v36 }
 0x6d8   :  { %805 = dma.vmem_to_hbm [thread:$0]  %s798_s14, 256, %s800_s17, [#allocation4], %s1071_s9, %s1071_s9, %s1072_s10  }
 0x6d9   :  { %1068 = dma.done.wait [#allocation4], 256  }
 0x6da   :  { %1069 = vsyncadd [#allocation4], 4294967040 }
 0x6db   :  { %810 = vsyncpa [#allocation3], 1 }
 0x6dc   :  { %811 = vsyncpa [#allocation6], 1 }
 0x6dd   :  { %812 = vsyncpa [#allocation9], 1 }
 0x6de   :  { %813 = vsyncpa [#allocation4], 1 }

</bundles_post_ra>
